<compile_context>
chip_gen: v7x
topology: tpu7x:2x2x1
jax: 0.10.0
libtpu: 0.0.40
codegen_flags: <defaults>
</compile_context>

<pallas_src>
import math
import functools

import jax
import jax.numpy as jnp
from jax.experimental import pallas as pl
from jax.experimental.pallas import tpu as pltpu


# ----------------------------------------------------------------------------
# Buffer setup (glue, plain JAX) — same values as the PyTorch module's `pe`.
# ----------------------------------------------------------------------------
def make_positional_encoding(d_model: int, max_len: int = 5000) -> jnp.ndarray:
    """Returns pe of shape [max_len, d_model] (the PyTorch buffer squeezed)."""
    position = jnp.arange(max_len, dtype=jnp.float32)[:, None]              # [L, 1]
    div_term = jnp.exp(
        jnp.arange(0, d_model, 2, dtype=jnp.float32)
        * (-math.log(10000.0) / d_model)
    )                                                                        # [D/2]
    ang = position * div_term                                                # [L, D/2]
    # even indices <- sin, odd indices <- cos (interleave)
    pe = jnp.stack([jnp.sin(ang), jnp.cos(ang)], axis=-1).reshape(max_len, d_model)
    return pe.astype(jnp.float32)


# ----------------------------------------------------------------------------
# Pallas kernels (operate on one (TS, TB, D) tile of x / (TS, D) tile of pe)
# ----------------------------------------------------------------------------
def _pe_add_kernel(x_ref, pe_ref, o_ref):
    """Eval-mode path: broadcast add only (dropout is identity)."""
    x = x_ref[...].astype(jnp.float32)        # [TS, TB, D]
    pe = pe_ref[...].astype(jnp.float32)      # [TS, D]
    o_ref[...] = (x + pe[:, None, :]).astype(o_ref.dtype)


def _pe_add_dropout_kernel(x_ref, pe_ref, bits_ref, o_ref, *, p: float):
    """Training path: broadcast add + inverted dropout (integer threshold)."""
    x = x_ref[...].astype(jnp.float32)        # [TS, TB, D]
    pe = pe_ref[...].astype(jnp.float32)      # [TS, D]
    y = x + pe[:, None, :]
    # drop iff bits < round(p * 2^32); keep-path scale fused into a single mul
    thr = min(max(int(round(p * 4294967296.0)), 0), 4294967295)
    keep = bits_ref[...] >= jnp.uint32(thr)
    scale = jnp.float32(1.0 / (1.0 - p))
    o_ref[...] = (y * jnp.where(keep, scale, jnp.float32(0.0))).astype(o_ref.dtype)


# ----------------------------------------------------------------------------
# Tiling: ~1 MiB tiles per streamed array -> ~8 MiB live with double buffering,
# safe under every generation's default scoped VMEM (16/32/32 MiB), yet big
# enough to amortize the ~0.35 us per-step grid overhead (~85% HBM roofline).
# ----------------------------------------------------------------------------
def _pick_tiles(S, B, D, itemsize, target_bytes=1 * 1024 * 1024):
    row_bytes = D * itemsize
    # batch tile: full B if cheap or small; otherwise a multiple of 8
    if B < 8 or B * row_bytes * 8 <= target_bytes:
        tb = B
    else:
        tb = (target_bytes // (row_bytes * 8)) // 8 * 8
        tb = max(8, min(tb, max(8, (B // 8) * 8)))
    # seq tile: multiple of 8 (or full S when S < 8) fitting the byte budget
    tile_row_bytes = max(1, tb * row_bytes)
    rows = max(1, target_bytes // tile_row_bytes)
    if S < 8:
        ts = S
    else:
        ts = max(8, (min(S, rows) // 8) * 8)
    return ts, tb


# ----------------------------------------------------------------------------
# Wrapper
# ----------------------------------------------------------------------------
@functools.partial(jax.jit, static_argnames=("p", "deterministic"))
def positional_encoding_forward(
    x: jnp.ndarray,          # [seq_len, batch, d_model]
    pe: jnp.ndarray,         # [max_len, d_model]
    key,                     # jax PRNG key for dropout
    *,
    p: float = 0.1,
    deterministic: bool = False,
):
    S, B, D = x.shape
    itemsize = jnp.dtype(x.dtype).itemsize
    TS, TB = _pick_tiles(S, B, D, itemsize)

    # pe rows are selected directly from the full buffer by the index_map
    # (no separate HBM copy of pe). Only for tiny S (< 8) take a static slice
    # so the pe block equals the (sliced) full array dims.
    pe_in = pe if TS % 8 == 0 else pe[:S]

    grid = (pl.cdiv(S, TS), pl.cdiv(B, TB))
    x_spec = pl.BlockSpec((TS, TB, D), lambda i, j: (i, j, 0))
    bits_spec = pl.BlockSpec((TS, TB, D), lambda i, j: (i, j, 0))
    pe_spec = pl.BlockSpec((TS, D), lambda i, j: (i, 0))      # reused across batch tiles
    out_spec = pl.BlockSpec((TS, TB, D), lambda i, j: (i, j, 0))
    cparams = pltpu.CompilerParams(
        dimension_semantics=("parallel", "parallel"))          # megacore on v7x
    out_shape = jax.ShapeDtypeStruct((S, B, D), x.dtype)

    if deterministic or p == 0.0:
        return pl.pallas_call(
            _pe_add_kernel,
            out_shape=out_shape,
            grid=grid,
            in_specs=[x_spec, pe_spec],
            out_specs=out_spec,
            compiler_params=cparams,
        )(x, pe_in)

    bits = jax.random.bits(key, (S, B, D), dtype=jnp.uint32)
    kernel = functools.partial(_pe_add_dropout_kernel, p=p)
    return pl.pallas_call(
        kernel,
        out_shape=out_shape,
        grid=grid,
        in_specs=[x_spec, pe_spec, bits_spec],
        out_specs=out_spec,
        compiler_params=cparams,
    )(x, pe_in, bits)


# ----------------------------------------------------------------------------
# Demo / smoke test
# ----------------------------------------------------------------------------
if __name__ == "__main__":
    seq_len, batch, d_model = 8, 2, 32
    max_len = 64
    drop_p = 0.1

    root = jax.random.PRNGKey(0)
    kx, kdrop = jax.random.split(root)
    x = jax.random.normal(kx, (seq_len, batch, d_model), dtype=jnp.float32)
    pe = make_positional_encoding(d_model, max_len)

    y_ref = x + pe[:seq_len][:, None, :]

    # 1) eval-mode (deterministic) path — check against pure-JAX reference.
    y_det = positional_encoding_forward(x, pe, kdrop, p=drop_p, deterministic=True)
    y_det = jax.block_until_ready(y_det)
    assert y_det.shape == (seq_len, batch, d_model)
    assert jnp.allclose(y_det, y_ref, atol=1e-5), "deterministic path mismatch"

    # 2) training-mode path with in-kernel inverted dropout.
    y_drop = positional_encoding_forward(x, pe, kdrop, p=drop_p, deterministic=False)
    y_drop = jax.block_until_ready(y_drop)
    assert y_drop.shape == (seq_len, batch, d_model)
    kept = y_drop != 0.0
    # kept elements must equal y_ref / (1 - p); dropped elements are exactly 0
    recon = jnp.where(kept, y_drop * (1.0 - drop_p), y_ref)
    assert jnp.allclose(recon, y_ref, atol=1e-5), "dropout path mismatch"
    drop_frac = float(jnp.mean(1.0 - kept.astype(jnp.float32)))
    assert 0.0 <= drop_frac <= 0.5, f"unexpected drop fraction {drop_frac}"

    print("KERNEL_OK")
</pallas_src>

<mosaic_0001>
module attributes {stable_mosaic.version = 11 : i64} {
  func.func @_pe_add_kernel(%arg0: i32, %arg1: i32, %arg2: memref<8x2x32xf32, #tpu.memory_space<vmem>>, %arg3: memref<8x32xf32, #tpu.memory_space<vmem>>, %arg4: memref<8x2x32xf32, #tpu.memory_space<vmem>>) attributes {dimension_semantics = [#tpu.dimension_semantics<parallel>, #tpu.dimension_semantics<parallel>], iteration_bounds = array<i64: 1, 1>, scalar_prefetch = 0 : i64, scratch_operands = 0 : i64, tpu.core_type = #tpu.core_type<tc>, window_params = [{transform_indices = @transform_0, window_bounds = array<i64: 8, 2, 32>}, {transform_indices = @transform_1, window_bounds = array<i64: 8, 32>}, {transform_indices = @transform_2, window_bounds = array<i64: 8, 2, 32>}]} {
    %c0 = arith.constant 0 : index
    %c0_0 = arith.constant 0 : index
    %c0_1 = arith.constant 0 : index
    %0 = vector.load %arg2[%c0, %c0_0, %c0_1] : memref<8x2x32xf32, #tpu.memory_space<vmem>>, vector<8x2x32xf32>
    %c0_2 = arith.constant 0 : index
    %c0_3 = arith.constant 0 : index
    %1 = vector.load %arg3[%c0_2, %c0_3] : memref<8x32xf32, #tpu.memory_space<vmem>>, vector<8x32xf32>
    %2 = vector.shape_cast %1 : vector<8x32xf32> to vector<8x1x32xf32>
    %3 = vector.broadcast %2 : vector<8x1x32xf32> to vector<8x2x32xf32>
    %4 = arith.addf %0, %3 : vector<8x2x32xf32>
    %c0_4 = arith.constant 0 : index
    %c0_5 = arith.constant 0 : index
    %c0_6 = arith.constant 0 : index
    %5 = vector.load %arg4[%c0_4, %c0_5, %c0_6] : memref<8x2x32xf32, #tpu.memory_space<vmem>>, vector<8x2x32xf32>
    tpu.vector_store %arg4[%c0_4, %c0_5, %c0_6], %4 {strides = array<i32>} : memref<8x2x32xf32, #tpu.memory_space<vmem>>, vector<8x2x32xf32>,
    return
  }
  func.func @transform_0(%arg0: i32, %arg1: i32) -> (i32, i32, i32) {
    %c0_i32 = arith.constant 0 : i32
    %c0_i32_0 = arith.constant 0 : i32
    return %arg0, %arg1, %c0_i32 : i32, i32, i32
  }
  func.func @transform_1(%arg0: i32, %arg1: i32) -> (i32, i32) {
    %c0_i32 = arith.constant 0 : i32
    %c0_i32_0 = arith.constant 0 : i32
    return %arg0, %c0_i32 : i32, i32
  }
  func.func @transform_2(%arg0: i32, %arg1: i32) -> (i32, i32, i32) {
    %c0_i32 = arith.constant 0 : i32
    %c0_i32_0 = arith.constant 0 : i32
    return %arg0, %arg1, %c0_i32 : i32, i32, i32
  }
}

</mosaic_0001>

<bundles_post_ra>
// kernel: positional_encoding_forward.1
= control target key start
LH: loop header
LB: loop body
LE: loop exit
PB: predicated region body
PF: predicated region fallthrough
CT: control target
= control target key end

     0   :  { %v26_v1 = vlaneseq  ;;  %v172_v2 = vmov 1966171168   ;;  %s238_s0 = inlined_call_operand.vmem [shape: f32[8,2,32], index: 0, kind: input, shape index: {}]   ;;  %s239_s1 = inlined_call_operand.vmem [shape: f32[64,32], index: 1, kind: input, shape index: {}]   ;;  %s240_s2 = inlined_call_operand.hbm [shape: f32[8,2,32], index: 2, kind: output, shape index: {}]  }
   0x1   :  { %v20_v0 = vld [vmem:[%s239_s1] sm:$0xff]  ;;  %v24_v3 = vunpack.c.l.s4 %v172_v2 }
   0x2   :  { %v27_v4 = vshrl.u32 %v26_v1, 7  ;;  %v22_v6 = vcombine.high %v20_v0, %v20_v0 }
   0x3   :  { %v25_v5 = vunpack.c.0.s8 %v24_v3 }
   0x4   :  { %7 = vsyncpa [#allocation3], 0  ;;  %v73_v9 = vsub.s32 0, %v27_v4  ;;  %v12_v15 = vld [vmem:[%s238_s0] sm:$0x3]  ;;  %vm119_vm0 = vcmask 254976  }
   0x5   :  { %v28_v7 = vsub.s32 %v25_v5, %v27_v4  ;;  %v16_v19 = vld [vmem:[%s238_s0 + $0x8] sm:$0x3]  ;;  %v13_v21 = vld [vmem:[%s238_s0 + $0x2] sm:$0x3]  ;;  %v14_v22 = vld [vmem:[%s238_s0 + $0x4] sm:$0x3] }
   0x6   :  { %v17_v29 = vld [vmem:[%s238_s0 + $0xa] sm:$0x3]  ;;  %v18_v30 = vld [vmem:[%s238_s0 + $0xc] sm:$0x3]  ;;  %v15_v31 = vld [vmem:[%s238_s0 + $0x6] sm:$0x3] }
   0x7   :  { %v29_v8 = vrot.slane %v20_v0, %v28_v7  ;;  %v36_v10 = vrot.slane %v22_v6, %v28_v7  ;;  %v19_v39 = vld [vmem:[%s238_s0 + $0xe] sm:$0x3]  ;;  %s173_s26 = smov [#allocation2]  }
   0x8   :  { %s133_s27 = sshll.u32 %s173_s26, 4  ;;  %s134_s27 = int_to_ptr.vmem [resolvable:$true] %s133_s27 }
   0x9   :  { %v45_v11 = vrot.slane %v29_v8, %v28_v7  ;;  %v37_v12 = vcombine.high %v29_v8, %v29_v8  ;;  %v52_v13 = vrot.slane %v36_v10, %v28_v7  ;;  %v38_v14 = vcombine.high %v36_v10, %v36_v10  ;;  %s148_s0 = scalar_lea.vmem %s134_s27, 256  ;;  %p153_p1 = scmp.lt.s32.totalorder %s134_s27, %s134_s27 }
   0xa   :  { %p149_p0 = scmp.ne.s32.totalorder %s134_s27, %s148_s0  ;;  %p154_p2 = scmp.lt.s32.totalorder %s148_s0, %s148_s0 }
   0xb   :  { %v74_v16 = vrot.slane %v45_v11, %v73_v9  ;;  %v59_v17 = vrot.slane %v37_v12, %v28_v7  ;;  %v67_v18 = vcombine.high %v45_v11, %v45_v11  ;;  %v90_v20 = vrot.slane %v52_v13, %v73_v9 }
   0xc   :  { %v66_v23 = vrot.slane %v38_v14, %v28_v7  ;;  %v68_v24 = vcombine.high %v52_v13, %v52_v13  ;;  %p155_p3 = por %p154_p2, %p153_p1 }
   0xd   :  { %v111_v25 = vadd.f32 %v74_v16, %v12_v15  ;;  %v78_v26 = vrot.slane %v59_v17, %v73_v9  ;;  %v82_v27 = vrot.slane %v67_v18, %v73_v9  ;;  %v69_v28 = vcombine.high %v59_v17, %v59_v17 }
   0xe   :  { %v115_v32 = vadd.f32 %v90_v20, %v16_v19  ;;  %v94_v33 = vrot.slane %v66_v23, %v73_v9  ;;  %v98_v34 = vrot.slane %v68_v24, %v73_v9  ;;  %v70_v35 = vcombine.high %v66_v23, %v66_v23  ;;  %p156_p4 = pnand %p155_p3, %p149_p0 }
   0xf   :  { %120 = vst.msk [vmem:[#allocation2] sm:$0x3] %vm119_vm0, %v111_v25  ;;  %v112_v36 = vadd.f32 %v78_v26, %v13_v21  ;;  %v113_v37 = vadd.f32 %v82_v27, %v14_v22  ;;  %v86_v38 = vrot.slane %v69_v28, %v73_v9 }
  0x10   :  { %124 = vst.msk [vmem:[#allocation2 + $0x8] sm:$0x3] %vm119_vm0, %v115_v32  ;;  %v116_v40 = vadd.f32 %v94_v33, %v17_v29  ;;  %v117_v41 = vadd.f32 %v98_v34, %v18_v30  ;;  %v102_v42 = vrot.slane %v70_v35, %v73_v9 }
  0x11   :  { %121 = vst.msk [vmem:[#allocation2 + $0x2] sm:$0x3] %vm119_vm0, %v112_v36  ;;  %122 = vst.msk [vmem:[#allocation2 + $0x4] sm:$0x3] %vm119_vm0, %v113_v37  ;;  %v114_v43 = vadd.f32 %v86_v38, %v15_v31 }
  0x12   :  { %125 = vst.msk [vmem:[#allocation2 + $0xa] sm:$0x3] %vm119_vm0, %v116_v40  ;;  %126 = vst.msk [vmem:[#allocation2 + $0xc] sm:$0x3] %vm119_vm0, %v117_v41  ;;  %v118_v44 = vadd.f32 %v102_v42, %v19_v39 }
  0x13   :  { %123 = vst.msk [vmem:[#allocation2 + $0x6] sm:$0x3] %vm119_vm0, %v114_v43 }
  0x14   :  { %127 = vst.msk [vmem:[#allocation2 + $0xe] sm:$0x3] %vm119_vm0, %v118_v44 }
  0x15   :  { %159 = shalt.err (!%p156_p4)
}
  0x16   :  { %s160_s30 = scalar_lea.hbm %s240_s2, 256 }
  0x17   :  { %p161_p5 = scmp.ne.s32.totalorder %s240_s2, %s160_s30  ;;  %p164_p6 = scmp.lt.u32.totalorder %s160_s30, %s240_s2 }
  0x19   :  { %p166_p7 = pnand %p164_p6, %p161_p5 }
  0x1b   :  { %169 = shalt.err (!%p166_p7)
}
  0x1c   :  { %s174_s7 = smov 32   ;;  %s175_s8 = smov 2  }
  0x1d   :  { %139 = dma.vmem_to_hbm [thread:$0]  %s134_s27, 256, %s240_s2, [#allocation3], %s174_s7, %s174_s7, %s175_s8  }
  0x1e   :  { %170 = dma.done.wait [#allocation3], 256  }
  0x1f   :  { %171 = vsyncadd [#allocation3], 4294967040 }
  0x20   :  { %143 = vsyncpa [#allocation3], 1 }

</bundles_post_ra>
